<compile_context>
chip_gen: v5e
topology: v5e:2x2
jax: 0.10.0
libtpu: 0.0.40
codegen_flags: <defaults>
</compile_context>

<pallas_src>
import math
from functools import partial

import jax
import jax.numpy as jnp
from jax.experimental import pallas as pl
from jax.experimental.pallas import tpu as pltpu


_LANES = 128
_INT8_SUBLANES = 32  # native sublane packing for int8 vregs


def _round_up(x, m):
    return ((x + m - 1) // m) * m


# ----------------------------- shared epilogue -----------------------------
def _correlation_math(a, d, b, c, n):
    """Correlation epilogue on (1,1) f32 values; single where-selected divide."""
    num = a * d - b * c
    a_plus_b = a + b
    a_plus_c = a + c
    # a*d > b*c : (ad-bc) / max(min(a+b, a+c)*len - (a+b)*(a+c), 1)
    denom_gt = jnp.maximum(
        jnp.minimum(a_plus_b, a_plus_c) * n - a_plus_b * a_plus_c, 1.0
    )
    # a*d <= b*c: (ad-bc) / max((a+b)*(a+c) - max(a-d, 0)*len, 1)
    denom_le = jnp.maximum(
        a_plus_b * a_plus_c - jnp.maximum(a - d, 0.0) * n, 1.0
    )
    denom = jnp.where(num > 0.0, denom_gt, denom_le)
    return num / denom


# ------------------------ forward() from stats buffers ----------------------
def _correlation_kernel(stats_ref, o_ref):
    # stats_ref: SMEM (8,) f32 = [a, d, b, c, len, 0, 0, 0]
    # o_ref:     VMEM (1, 1) f32
    def splat(i):
        return jnp.full((1, 1), stats_ref[i], dtype=jnp.float32)

    a, d, b, c, n = splat(0), splat(1), splat(2), splat(3), splat(4)
    o_ref[...] = _correlation_math(a, d, b, c, n)


@jax.jit
def correlation_forward(paired_11_a, paired_00_d, paired_10_b, paired_01_c, length):
    """Pallas implementation of Correlation.forward().

    Inputs are shape-(1,) float32 arrays (the torch buffers); output is a
    shape-(1,) float32 array.
    """
    stats = jnp.concatenate(
        [
            jnp.asarray(paired_11_a, jnp.float32).reshape(1),
            jnp.asarray(paired_00_d, jnp.float32).reshape(1),
            jnp.asarray(paired_10_b, jnp.float32).reshape(1),
            jnp.asarray(paired_01_c, jnp.float32).reshape(1),
            jnp.asarray(length, jnp.float32).reshape(1),
            jnp.zeros((3,), jnp.float32),
        ]
    )
    out = pl.pallas_call(
        _correlation_kernel,
        out_shape=jax.ShapeDtypeStruct((1, 1), jnp.float32),
        in_specs=[pl.BlockSpec(memory_space=pltpu.MemorySpace.SMEM)],
        out_specs=pl.BlockSpec(memory_space=pltpu.MemorySpace.VMEM),
    )(stats)
    return out.reshape(1)


# ---------------- fused Monitor() reduction + forward() epilogue -------------
def _make_fused_kernel(true_len):
    def kernel(b1_ref, b2_ref, o_ref, s1_ref, s2_ref, a_ref):
        # b1_ref / b2_ref: VMEM (rows_per_tile, 128) int8 tiles of the streams.
        # o_ref:           VMEM (1, 1) f32 (resident across the grid).
        # s1/s2/a_ref:     VMEM (1, 128) f32 per-lane partial-count scratch.
        step = pl.program_id(0)

        @pl.when(step == 0)
        def _init():
            s1_ref[...] = jnp.zeros_like(s1_ref)
            s2_ref[...] = jnp.zeros_like(s2_ref)
            a_ref[...] = jnp.zeros_like(a_ref)

        x1 = b1_ref[...].astype(jnp.float32)           # (R, 128) 0/1
        x2 = b2_ref[...].astype(jnp.float32)
        # Only 3 reductions needed; padded zeros contribute nothing.
        s1_ref[...] += jnp.sum(x1, axis=0, keepdims=True)
        s2_ref[...] += jnp.sum(x2, axis=0, keepdims=True)
        a_ref[...] += jnp.sum(x1 * x2, axis=0, keepdims=True)

        @pl.when(step == pl.num_programs(0) - 1)
        def _fin():
            s1 = jnp.sum(s1_ref[...], axis=-1, keepdims=True)   # (1, 1)
            s2 = jnp.sum(s2_ref[...], axis=-1, keepdims=True)
            a = jnp.sum(a_ref[...], axis=-1, keepdims=True)
            n = jnp.full((1, 1), float(true_len), jnp.float32)   # true length
            b = s1 - a
            c = s2 - a
            d = n - s1 - s2 + a
            o_ref[...] = _correlation_math(a, d, b, c, n)

    return kernel


@partial(jax.jit, static_argnames=("max_rows_per_tile",))
def correlation_from_bitstreams(bits_1, bits_2, max_rows_per_tile=1024):
    """Fused: accumulate the SC pairing stats over full bit streams and compute
    the correlation in a single pallas_call, tiled over the stream length."""
    L = int(bits_1.shape[0])

    rows_needed = _round_up(max(1, math.ceil(L / _LANES)), _INT8_SUBLANES)
    rows_per_tile = _round_up(min(int(max_rows_per_tile), rows_needed),
                              _INT8_SUBLANES)
    n_tiles = math.ceil(rows_needed / rows_per_tile)
    padded_rows = n_tiles * rows_per_tile
    padded_len = padded_rows * _LANES

    # int8 0/1 bits over the wire; cast to f32 only inside the kernel.
    b1 = (bits_1 != 0).astype(jnp.int8)
    b2 = (bits_2 != 0).astype(jnp.int8)
    pad = padded_len - L
    if pad:
        b1 = jnp.pad(b1, (0, pad))
        b2 = jnp.pad(b2, (0, pad))
    b1 = b1.reshape(padded_rows, _LANES)
    b2 = b2.reshape(padded_rows, _LANES)

    out = pl.pallas_call(
        _make_fused_kernel(L),
        out_shape=jax.ShapeDtypeStruct((1, 1), jnp.float32),
        grid_spec=pltpu.PrefetchScalarGridSpec(
            num_scalar_prefetch=0,
            grid=(n_tiles,),
            in_specs=[
                pl.BlockSpec((rows_per_tile, _LANES), lambda i: (i, 0)),
                pl.BlockSpec((rows_per_tile, _LANES), lambda i: (i, 0)),
            ],
            out_specs=pl.BlockSpec((1, 1), lambda i: (0, 0)),
            scratch_shapes=[pltpu.VMEM((1, _LANES), jnp.float32)] * 3,
        ),
        compiler_params=pltpu.CompilerParams(
            dimension_semantics=("arbitrary",),
            vmem_limit_bytes=32 * 1024 * 1024,
        ),
    )(b1, b2)
    return out.reshape(1)


# -------------------- plain-JAX glue: Monitor() simulation -------------------
def simulate_monitor(bits_1, bits_2):
    """Accumulate the SC pairing stats exactly like Correlation.Monitor would
    when called once per bit with two explicit bit streams."""
    bits_1 = bits_1.astype(jnp.float32)
    bits_2 = bits_2.astype(jnp.float32)
    in1_is_0 = (bits_1 == 0).astype(jnp.float32)
    in1_is_1 = 1.0 - in1_is_0
    in2_is_0 = (bits_2 == 0).astype(jnp.float32)
    in2_is_1 = 1.0 - in2_is_0
    d = jnp.sum(in1_is_0 * in2_is_0).reshape(1)
    c = jnp.sum(in1_is_0 * in2_is_1).reshape(1)
    b = jnp.sum(in1_is_1 * in2_is_0).reshape(1)
    a = jnp.sum(in1_is_1 * in2_is_1).reshape(1)
    n = jnp.asarray([bits_1.shape[0]], jnp.float32)
    return a, d, b, c, n


def reference_forward(a, d, b, c, n):
    ad_minus_bc = a * d - b * c
    ad_gt_bc = (ad_minus_bc > 0).astype(jnp.float32)
    ad_le_bc = 1.0 - ad_gt_bc
    a_plus_b = a + b
    a_plus_c = a + c
    a_minus_d = a - d
    corr_gt = ad_minus_bc / jnp.maximum(
        jnp.minimum(a_plus_b, a_plus_c) * n - a_plus_b * a_plus_c, 1.0
    )
    corr_le = ad_minus_bc / jnp.maximum(
        a_plus_b * a_plus_c - jnp.maximum(a_minus_d, 0.0) * n, 1.0
    )
    return ad_gt_bc * corr_gt + ad_le_bc * corr_le


if __name__ == "__main__":
    key = jax.random.PRNGKey(0)
    k1, k2, k3, k4 = jax.random.split(key, 4)

    # --- small stream pair (single tile) ---
    stream_len = 64
    bits_1 = (jax.random.uniform(k1, (stream_len,)) < 0.6).astype(jnp.float32)
    bits_2 = (jax.random.uniform(k2, (stream_len,)) < 0.4).astype(jnp.float32)

    a, d, b, c, n = simulate_monitor(bits_1, bits_2)
    ref = reference_forward(a, d, b, c, n)

    # forward() from the accumulated stats buffers (packed SMEM input).
    out = jax.block_until_ready(correlation_forward(a, d, b, c, n))
    assert out.shape == (1,) and out.dtype == jnp.float32
    assert jnp.allclose(out, ref, atol=1e-6, rtol=1e-6), (out, ref)

    # Fused Monitor-reduction + forward() in a single pallas_call.
    out_fused = jax.block_until_ready(correlation_from_bitstreams(bits_1, bits_2))
    assert out_fused.shape == (1,) and out_fused.dtype == jnp.float32
    assert jnp.allclose(out_fused, ref, atol=1e-6, rtol=1e-6), (out_fused, ref)

    # --- longer stream pair, forced onto a multi-step grid (exercises the
    # accumulator / pipelined-tile path: 32-row int8 tiles -> 2 grid steps) ---
    stream_len_b = 6000
    bits_1b = (jax.random.uniform(k3, (stream_len_b,)) < 0.55).astype(jnp.float32)
    bits_2b = (jax.random.uniform(k4, (stream_len_b,)) < 0.45).astype(jnp.float32)
    ab, db, bb, cb, nb = simulate_monitor(bits_1b, bits_2b)
    ref_b = reference_forward(ab, db, bb, cb, nb)
    out_b = jax.block_until_ready(
        correlation_from_bitstreams(bits_1b, bits_2b, max_rows_per_tile=32)
    )
    assert jnp.allclose(out_b, ref_b, atol=1e-6, rtol=1e-6), (out_b, ref_b)

    print("KERNEL_OK")
</pallas_src>

<mosaic_0001>
module attributes {stable_mosaic.version = 11 : i64} {
  func.func @_correlation_kernel(%arg0: memref<8xf32, #tpu.memory_space<smem>>, %arg1: memref<1x1xf32, #tpu.memory_space<vmem>>) attributes {dimension_semantics = [], scalar_prefetch = 0 : i64, scratch_operands = 0 : i64, tpu.core_type = #tpu.core_type<tc>} {
    %c0 = arith.constant 0 : index
    %0 = memref.load %arg0[%c0] : memref<8xf32, #tpu.memory_space<smem>>
    %1 = vector.broadcast %0 : f32 to vector<1x1xf32>
    %c1 = arith.constant 1 : index
    %2 = memref.load %arg0[%c1] : memref<8xf32, #tpu.memory_space<smem>>
    %3 = vector.broadcast %2 : f32 to vector<1x1xf32>
    %c2 = arith.constant 2 : index
    %4 = memref.load %arg0[%c2] : memref<8xf32, #tpu.memory_space<smem>>
    %5 = vector.broadcast %4 : f32 to vector<1x1xf32>
    %c3 = arith.constant 3 : index
    %6 = memref.load %arg0[%c3] : memref<8xf32, #tpu.memory_space<smem>>
    %7 = vector.broadcast %6 : f32 to vector<1x1xf32>
    %c4 = arith.constant 4 : index
    %8 = memref.load %arg0[%c4] : memref<8xf32, #tpu.memory_space<smem>>
    %9 = vector.broadcast %8 : f32 to vector<1x1xf32>
    %10 = arith.mulf %1, %3 : vector<1x1xf32>
    %11 = arith.mulf %5, %7 : vector<1x1xf32>
    %12 = arith.subf %10, %11 : vector<1x1xf32>
    %13 = arith.addf %1, %5 : vector<1x1xf32>
    %14 = arith.addf %1, %7 : vector<1x1xf32>
    %15 = arith.minimumf %13, %14 : vector<1x1xf32>
    %16 = arith.mulf %15, %9 : vector<1x1xf32>
    %17 = arith.mulf %13, %14 : vector<1x1xf32>
    %18 = arith.subf %16, %17 : vector<1x1xf32>
    %cst = arith.constant 1.000000e+00 : f32
    %19 = vector.broadcast %cst : f32 to vector<1x1xf32>
    %20 = arith.maximumf %18, %19 : vector<1x1xf32>
    %21 = arith.mulf %13, %14 : vector<1x1xf32>
    %22 = arith.subf %1, %3 : vector<1x1xf32>
    %cst_0 = arith.constant 0.000000e+00 : f32
    %23 = vector.broadcast %cst_0 : f32 to vector<1x1xf32>
    %24 = arith.maximumf %22, %23 : vector<1x1xf32>
    %25 = arith.mulf %24, %9 : vector<1x1xf32>
    %26 = arith.subf %21, %25 : vector<1x1xf32>
    %cst_1 = arith.constant 1.000000e+00 : f32
    %27 = vector.broadcast %cst_1 : f32 to vector<1x1xf32>
    %28 = arith.maximumf %26, %27 : vector<1x1xf32>
    %cst_2 = arith.constant 0.000000e+00 : f32
    %29 = vector.broadcast %cst_2 : f32 to vector<1x1xf32>
    %30 = arith.cmpf ogt, %12, %29 : vector<1x1xf32>
    %31 = arith.select %30, %20, %28 : vector<1x1xi1>, vector<1x1xf32>
    %32 = arith.divf %12, %31 : vector<1x1xf32>
    %c0_3 = arith.constant 0 : index
    %c0_4 = arith.constant 0 : index
    %33 = vector.load %arg1[%c0_3, %c0_4] : memref<1x1xf32, #tpu.memory_space<vmem>>, vector<1x1xf32>
    tpu.vector_store %arg1[%c0_3, %c0_4], %32 {strides = array<i32>} : memref<1x1xf32, #tpu.memory_space<vmem>>, vector<1x1xf32>,
    return
  }
}

</mosaic_0001>

<bundles_post_ra>
// kernel: correlation_forward.1
= control target key start
LH: loop header
LB: loop body
LE: loop exit
PB: predicated region body
PF: predicated region fallthrough
CT: control target
= control target key end

     0   :  { %6 = vsyncpa [#allocation4], 0  ;;  %s149_s0 = inlined_call_operand.vmem [shape: f32[8], index: 0, kind: input, shape index: {}]   ;;  %s150_s1 = inlined_call_operand.hbm [shape: f32[1,1], index: 1, kind: output, shape index: {}]  }
   0x1   :  { %7 = vsyncpa [#allocation3], 0  ;;  %s13_s8 = sshll.u32 %s149_s0, 4  ;;  %s131_s9 = smov [#allocation2]   ;;  %s14_s8 = int_to_ptr.vmem [resolvable:$true] %s13_s8 }
   0x2   :  { %16 = dma.vmem_to_smem %s14_s8, 16, %s131_s9, [#allocation4]  }
   0x3   :  { %127 = dma.done.wait [#allocation4], 16  }
   0x4   :  { %128 = vsyncadd [#allocation4], 4294967280 }
   0x5   :  { %21 = sfence }
   0x6   :  { %s22_s10 = sld [smem:[#allocation2]]  ;;  %s132_s0 = smov [#allocation5]   ;;  %vm64_vm5 = vcmask 0  }
   0x7   :  { %s83_s11 = sld [smem:[#allocation2 + $0x1]]  ;;  %s71_s15 = sshll.u32 %s132_s0, 4  ;;  %s72_s15 = int_to_ptr.vmem [resolvable:$true] %s71_s15 }
   0x8   :  { %s84_s12 = sld [smem:[#allocation2 + $0x2]]  ;;  %s73_s18 = sshll.u32 %s150_s1, 4  ;;  %s74_s18 = int_to_ptr.hbm [resolvable:$true] %s73_s18 }
   0x9   :  { %s85_s13 = sld [smem:[#allocation2 + $0x3]] }
   0xa   :  { %s86_s14 = sld [smem:[#allocation2 + $0x4]] }
   0xc   :  { %v23_v0 = vstv %s22_s10 }
   0xd   :  { %v25_v1 = vstv %s83_s11 }
   0xe   :  { %v27_v2 = vstv %s84_s12  ;;  %v42_v3 = vsub.f32 %v23_v0, %v25_v1  ;;  %v32_v5 = vmul.f32 %v25_v1, %v23_v0 }
   0xf   :  { %v29_v4 = vstv %s85_s13  ;;  %v35_v6 = vadd.f32 %v27_v2, %v23_v0 }
  0x10   :  { %v31_v7 = vstv %s86_s14  ;;  %v33_v8 = vmul.f32 %v29_v4, %v27_v2  ;;  %v36_v9 = vadd.f32 %v29_v4, %v23_v0  ;;  %v43_v10 = vmax.f32 %v42_v3, 0.0 }
  0x12   :  { %v37_v11 = vmin.f32 %v35_v6, %v36_v9  ;;  %v39_v12 = vmul.f32 %v36_v9, %v35_v6  ;;  %v44_v13 = vmul.f32 %v43_v10, %v31_v7  ;;  %v34_v14 = vsub.f32 %v32_v5, %v33_v8 }
  0x14   :  { %v38_v15 = vmul.f32 %v37_v11, %v31_v7  ;;  %v45_v16 = vsub.f32 %v39_v12, %v44_v13  ;;  %vm47_vm0 = vcmp.gt.f32.partialorder %v34_v14, 0.0 }
  0x16   :  { %v40_v17 = vsub.f32 %v38_v15, %v39_v12  ;;  %v46_v18 = vmax.f32 %v45_v16, 1.0 }
  0x18   :  { %v41_v19 = vmax.f32 %v40_v17, 1.0 }
  0x1a   :  { %v48_v20 = vsel %vm47_vm0, %v41_v19, %v46_v18 }
  0x1b   :  { %89 = vrcp.f32 %v48_v20  ;;  %v60_v23 = vand.u32 2147483648, %v48_v20  ;;  %vm54_vm1 = vweird.f32 %v48_v20  ;;  %v58_v25 = vand.u32 2147483647, %v48_v20 }
  0x1d   :  { %v61_v27 = vor.u32 1.1754944e-38, %v60_v23  ;;  %vm59_vm4 = vcmp.eq.f32.partialorder %v58_v25, 8.507059e+37 }
  0x21   :  { %v90_v21 = vpop.eup %89 }
  0x22   :  { %v50_v22 = vmul.f32 %v90_v21, %v48_v20  ;;  %vm55_vm2 = vweird.f32 %v90_v21 }
  0x23   :  { %vm56_vm3 = vmor %vm54_vm1, %vm55_vm2 }
  0x24   :  { %v51_v24 = vsub.f32 1.0, %v50_v22 }
  0x26   :  { %v52_v26 = vmul.f32 %v90_v21, %v51_v24 }
  0x28   :  { %v53_v28 = vadd.f32 %v90_v21, %v52_v26 }
  0x2a   :  { %v57_v29 = vsel %vm56_vm3, %v90_v21, %v53_v28 }
  0x2b   :  { %v62_v30 = vsel %vm59_vm4, %v61_v27, %v57_v29 }
  0x2c   :  { %v63_v31 = vmul.f32 %v62_v30, %v34_v14 }
  0x2e   :  { %65 = vst.msk [vmem:[#allocation5] sm:$0x1] %vm64_vm5, %v63_v31 }
  0x2f   :  { %76 = dma.vmem_to_hbm [thread:$0]  %s72_s15, 16, %s74_s18, [#allocation3]  }
  0x30   :  { %129 = dma.done.wait [#allocation3], 16  }
  0x31   :  { %130 = vsyncadd [#allocation3], 4294967280 }
  0x32   :  { %81 = vsyncpa [#allocation3], 1 }
  0x33   :  { %82 = vsyncpa [#allocation4], 1 }

</bundles_post_ra>
